<compile_context>
chip_gen: v7x
topology: tpu7x:2x2x1
jax: 0.10.0
libtpu: 0.0.40
codegen_flags: <defaults>
</compile_context>

<pallas_src>
import functools

import jax
import jax.numpy as jnp
from jax.experimental import pallas as pl
from jax.experimental.pallas import tpu as pltpu


def _conv_taps_kernel(x_ref, w_ref, b_ref, o_ref, *, KH, KW, Wp, MP, stride,
                      compute_dtype):
    # x_ref: (C, Lpad)       f32, flattened zero-padded input, one batch element
    # w_ref: (KH*KW, OC, C)  compute_dtype, VMEM resident across the grid
    # b_ref: (OC, 1)         f32, VMEM resident
    # o_ref: (OC, MP)        MP = OH * Wp (padded-width-flattened output, lanes)
    xv = x_ref[...]                        # one aligned load of the whole block
    acc = None
    for kh in range(KH):                   # KH*KW is small & static: full unroll
        for kw in range(KW):
            k = kh * KW + kw
            off = kh * Wp + kw
            # Shifted (and, for stride > 1, strided) window of the flat axis:
            #   p[c, oh*Wp + ow] = x_pad[c, oh*stride + kh, ow*stride + kw]
            if stride == 1:
                p = xv[:, off:off + MP]                               # (C, MP)
            else:
                p = xv[:, off:off + stride * (MP - 1) + 1:stride]     # (C, MP)
            d = jnp.dot(w_ref[k], p.astype(compute_dtype),
                        preferred_element_type=jnp.float32)           # (OC, MP)
            acc = d if acc is None else acc + d
    # Epilogue in f32: bias add + cast, written once per grid step.
    o_ref[...] = (acc + b_ref[...]).astype(o_ref.dtype)


@functools.partial(jax.jit, static_argnames=("stride", "padding", "compute_dtype"))
def parallel_conv2d(x_nchw, weights, biases, *, stride, padding,
                    compute_dtype=jnp.bfloat16):
    """Equivalent of ParallelConv2d.forward.

    Each shard i computes conv2d(x, weights[i]) + biases[i]; shard outputs are
    concatenated along the channel dim.  Since conv is linear per output
    channel, this equals one conv with the concatenated parameters.
    """
    w = jnp.concatenate(weights, axis=0)   # (OC, C, KH, KW)  [OIHW]
    b = jnp.concatenate(biases, axis=0)    # (OC,)

    N, C, H, W = x_nchw.shape
    OC, _, KH, KW = w.shape
    OH = (H + 2 * padding - KH) // stride + 1
    OW = (W + 2 * padding - KW) // stride + 1
    Hp, Wp = H + 2 * padding, W + 2 * padding

    # Flattened, zero-padded input: (N, C, Hp*Wp), tail-padded so every tap's
    # shifted window stays in bounds.
    xp = jnp.pad(x_nchw, ((0, 0), (0, 0), (padding, padding), (padding, padding)))
    L = Hp * Wp
    MP = OH * Wp                                        # lane-dense output length
    L_need = (KH - 1) * Wp + (KW - 1) + stride * (MP - 1) + 1
    xf = xp.reshape(N, C, L)
    if L_need > L:
        xf = jnp.pad(xf, ((0, 0), (0, 0), (0, L_need - L)))
    Lpad = max(L, L_need)

    # Weight taps: w_k[kh*KW + kw, oc, c] = w[oc, c, kh, kw]; bias stays f32.
    w_k = jnp.transpose(w, (2, 3, 0, 1)).reshape(KH * KW, OC, C).astype(compute_dtype)
    b_k = b.reshape(OC, 1).astype(jnp.float32)

    kernel = functools.partial(_conv_taps_kernel, KH=KH, KW=KW, Wp=Wp, MP=MP,
                               stride=stride, compute_dtype=compute_dtype)

    out_flat = pl.pallas_call(
        kernel,
        out_shape=jax.ShapeDtypeStruct((N, OC, MP), x_nchw.dtype),
        grid_spec=pltpu.PrefetchScalarGridSpec(
            num_scalar_prefetch=0,
            grid=(N,),
            in_specs=[
                # Whole flattened image per batch element (block = full dims).
                pl.BlockSpec((None, C, Lpad), lambda n: (n, 0, 0)),
                # Weights & bias: constant index_map -> stay resident in VMEM.
                pl.BlockSpec((KH * KW, OC, C), lambda n: (0, 0, 0)),
                pl.BlockSpec((OC, 1), lambda n: (0, 0)),
            ],
            out_specs=pl.BlockSpec((None, OC, MP), lambda n: (n, 0, 0)),
        ),
        compiler_params=pltpu.CompilerParams(
            dimension_semantics=("parallel",),
            vmem_limit_bytes=32 * 1024 * 1024),
    )(xf, w_k, b_k)

    # (N, OC, OH*Wp) -> (N, OC, OH, Wp) -> crop the padded-width garbage columns.
    # Already NCHW: no transpose needed.
    out = out_flat.reshape(N, OC, OH, Wp)[..., :OW]
    return out


if __name__ == "__main__":
    # Module hyper-parameters (small, consistent with the nn.Module).
    in_channels, out_channels = 4, 8
    kernel_size, stride, padding = 3, 1, 1
    num_gpus = 2
    oc_per_gpu = out_channels // num_gpus

    # Deterministic parameter init (PyTorch Conv2d-style uniform bounds).
    key = jax.random.PRNGKey(0)
    kx, *kparams = jax.random.split(key, 1 + 2 * num_gpus)
    x = jax.random.normal(kx, (2, in_channels, 16, 16), dtype=jnp.float32)

    fan_in = in_channels * kernel_size * kernel_size
    bound = 1.0 / (fan_in ** 0.5)
    weights, biases = [], []
    for i in range(num_gpus):
        weights.append(jax.random.uniform(
            kparams[2 * i], (oc_per_gpu, in_channels, kernel_size, kernel_size),
            minval=-bound, maxval=bound, dtype=jnp.float32))
        biases.append(jax.random.uniform(
            kparams[2 * i + 1], (oc_per_gpu,),
            minval=-bound, maxval=bound, dtype=jnp.float32))

    out = parallel_conv2d(x, weights, biases, stride=stride, padding=padding)
    out = jax.block_until_ready(out)

    # Reference: XLA conv at the same precision (bf16 MXU operands, f32 accum).
    w_full = jnp.concatenate(weights, axis=0)
    b_full = jnp.concatenate(biases, axis=0)
    ref = jax.lax.conv_general_dilated(
        x.astype(jnp.bfloat16), w_full.astype(jnp.bfloat16),
        window_strides=(stride, stride),
        padding=[(padding, padding), (padding, padding)],
        dimension_numbers=("NCHW", "OIHW", "NCHW"),
        preferred_element_type=jnp.float32) + b_full[None, :, None, None]

    assert out.shape == (2, out_channels, 16, 16), out.shape
    assert jnp.allclose(out, ref, atol=1e-2, rtol=1e-2), \
        float(jnp.max(jnp.abs(out - ref)))
    print("KERNEL_OK")
</pallas_src>

<mosaic_0001>
module attributes {stable_mosaic.version = 11 : i64} {
  func.func @_conv_taps_kernel(%arg0: i32, %arg1: memref<1x4x326xf32, #tpu.memory_space<vmem>>, %arg2: memref<9x8x4xbf16, #tpu.memory_space<vmem>>, %arg3: memref<8x1xf32, #tpu.memory_space<vmem>>, %arg4: memref<1x8x288xf32, #tpu.memory_space<vmem>>) attributes {dimension_semantics = [#tpu.dimension_semantics<parallel>], iteration_bounds = array<i64: 2>, scalar_prefetch = 0 : i64, scratch_operands = 0 : i64, tpu.core_type = #tpu.core_type<tc>, window_params = [{transform_indices = @transform_0, window_bounds = array<i64: 1, 4, 326>}, {pipeline_mode = #tpu.pipeline_mode<synchronous>, transform_indices = @transform_1, window_bounds = array<i64: 9, 8, 4>}, {pipeline_mode = #tpu.pipeline_mode<synchronous>, transform_indices = @transform_2, window_bounds = array<i64: 8, 1>}, {transform_indices = @transform_3, window_bounds = array<i64: 1, 8, 288>}]} {
    %c0 = arith.constant 0 : index
    %c0_0 = arith.constant 0 : index
    %c0_1 = arith.constant 0 : index
    %0 = vector.load %arg1[%c0, %c0_0, %c0_1] : memref<1x4x326xf32, #tpu.memory_space<vmem>>, vector<1x4x326xf32>
    %1 = vector.shape_cast %0 : vector<1x4x326xf32> to vector<4x326xf32>
    %2 = vector.extract_strided_slice %1 {offsets = [0, 0], sizes = [4, 288], strides = [1, 1]} : vector<4x326xf32> to vector<4x288xf32>
    %c0_2 = arith.constant 0 : index
    %c0_3 = arith.constant 0 : index
    %c0_4 = arith.constant 0 : index
    %3 = vector.load %arg2[%c0_2, %c0_3, %c0_4] : memref<9x8x4xbf16, #tpu.memory_space<vmem>>, vector<1x8x4xbf16>
    %4 = vector.shape_cast %3 : vector<1x8x4xbf16> to vector<8x4xbf16>
    %5 = arith.truncf %2 : vector<4x288xf32> to vector<4x288xbf16>
    %cst = arith.constant dense<0.000000e+00> : vector<8x288xf32>
    %6 = tpu.matmul %4, %5, %cst {dimension_numbers = #tpu.dot_dimension_numbers<[1], [0], [0], [1], [0, 0, 1, 1], [], []>} : vector<8x4xbf16>, vector<4x288xbf16>, vector<8x288xf32> -> vector<8x288xf32>
    %7 = vector.extract_strided_slice %1 {offsets = [0, 1], sizes = [4, 288], strides = [1, 1]} : vector<4x326xf32> to vector<4x288xf32>
    %c1 = arith.constant 1 : index
    %c0_5 = arith.constant 0 : index
    %c0_6 = arith.constant 0 : index
    %8 = vector.load %arg2[%c1, %c0_5, %c0_6] : memref<9x8x4xbf16, #tpu.memory_space<vmem>>, vector<1x8x4xbf16>
    %9 = vector.shape_cast %8 : vector<1x8x4xbf16> to vector<8x4xbf16>
    %10 = arith.truncf %7 : vector<4x288xf32> to vector<4x288xbf16>
    %cst_7 = arith.constant dense<0.000000e+00> : vector<8x288xf32>
    %11 = tpu.matmul %9, %10, %cst_7 {dimension_numbers = #tpu.dot_dimension_numbers<[1], [0], [0], [1], [0, 0, 1, 1], [], []>} : vector<8x4xbf16>, vector<4x288xbf16>, vector<8x288xf32> -> vector<8x288xf32>
    %12 = arith.addf %6, %11 : vector<8x288xf32>
    %13 = vector.extract_strided_slice %1 {offsets = [0, 2], sizes = [4, 288], strides = [1, 1]} : vector<4x326xf32> to vector<4x288xf32>
    %c2 = arith.constant 2 : index
    %c0_8 = arith.constant 0 : index
    %c0_9 = arith.constant 0 : index
    %14 = vector.load %arg2[%c2, %c0_8, %c0_9] : memref<9x8x4xbf16, #tpu.memory_space<vmem>>, vector<1x8x4xbf16>
    %15 = vector.shape_cast %14 : vector<1x8x4xbf16> to vector<8x4xbf16>
    %16 = arith.truncf %13 : vector<4x288xf32> to vector<4x288xbf16>
    %cst_10 = arith.constant dense<0.000000e+00> : vector<8x288xf32>
    %17 = tpu.matmul %15, %16, %cst_10 {dimension_numbers = #tpu.dot_dimension_numbers<[1], [0], [0], [1], [0, 0, 1, 1], [], []>} : vector<8x4xbf16>, vector<4x288xbf16>, vector<8x288xf32> -> vector<8x288xf32>
    %18 = arith.addf %12, %17 : vector<8x288xf32>
    %19 = vector.extract_strided_slice %1 {offsets = [0, 18], sizes = [4, 288], strides = [1, 1]} : vector<4x326xf32> to vector<4x288xf32>
    %c3 = arith.constant 3 : index
    %c0_11 = arith.constant 0 : index
    %c0_12 = arith.constant 0 : index
    %20 = vector.load %arg2[%c3, %c0_11, %c0_12] : memref<9x8x4xbf16, #tpu.memory_space<vmem>>, vector<1x8x4xbf16>
    %21 = vector.shape_cast %20 : vector<1x8x4xbf16> to vector<8x4xbf16>
    %22 = arith.truncf %19 : vector<4x288xf32> to vector<4x288xbf16>
    %cst_13 = arith.constant dense<0.000000e+00> : vector<8x288xf32>
    %23 = tpu.matmul %21, %22, %cst_13 {dimension_numbers = #tpu.dot_dimension_numbers<[1], [0], [0], [1], [0, 0, 1, 1], [], []>} : vector<8x4xbf16>, vector<4x288xbf16>, vector<8x288xf32> -> vector<8x288xf32>
    %24 = arith.addf %18, %23 : vector<8x288xf32>
    %25 = vector.extract_strided_slice %1 {offsets = [0, 19], sizes = [4, 288], strides = [1, 1]} : vector<4x326xf32> to vector<4x288xf32>
    %c4 = arith.constant 4 : index
    %c0_14 = arith.constant 0 : index
    %c0_15 = arith.constant 0 : index
    %26 = vector.load %arg2[%c4, %c0_14, %c0_15] : memref<9x8x4xbf16, #tpu.memory_space<vmem>>, vector<1x8x4xbf16>
    %27 = vector.shape_cast %26 : vector<1x8x4xbf16> to vector<8x4xbf16>
    %28 = arith.truncf %25 : vector<4x288xf32> to vector<4x288xbf16>
    %cst_16 = arith.constant dense<0.000000e+00> : vector<8x288xf32>
    %29 = tpu.matmul %27, %28, %cst_16 {dimension_numbers = #tpu.dot_dimension_numbers<[1], [0], [0], [1], [0, 0, 1, 1], [], []>} : vector<8x4xbf16>, vector<4x288xbf16>, vector<8x288xf32> -> vector<8x288xf32>
    %30 = arith.addf %24, %29 : vector<8x288xf32>
    %31 = vector.extract_strided_slice %1 {offsets = [0, 20], sizes = [4, 288], strides = [1, 1]} : vector<4x326xf32> to vector<4x288xf32>
    %c5 = arith.constant 5 : index
    %c0_17 = arith.constant 0 : index
    %c0_18 = arith.constant 0 : index
    %32 = vector.load %arg2[%c5, %c0_17, %c0_18] : memref<9x8x4xbf16, #tpu.memory_space<vmem>>, vector<1x8x4xbf16>
    %33 = vector.shape_cast %32 : vector<1x8x4xbf16> to vector<8x4xbf16>
    %34 = arith.truncf %31 : vector<4x288xf32> to vector<4x288xbf16>
    %cst_19 = arith.constant dense<0.000000e+00> : vector<8x288xf32>
    %35 = tpu.matmul %33, %34, %cst_19 {dimension_numbers = #tpu.dot_dimension_numbers<[1], [0], [0], [1], [0, 0, 1, 1], [], []>} : vector<8x4xbf16>, vector<4x288xbf16>, vector<8x288xf32> -> vector<8x288xf32>
    %36 = arith.addf %30, %35 : vector<8x288xf32>
    %37 = vector.extract_strided_slice %1 {offsets = [0, 36], sizes = [4, 288], strides = [1, 1]} : vector<4x326xf32> to vector<4x288xf32>
    %c6 = arith.constant 6 : index
    %c0_20 = arith.constant 0 : index
    %c0_21 = arith.constant 0 : index
    %38 = vector.load %arg2[%c6, %c0_20, %c0_21] : memref<9x8x4xbf16, #tpu.memory_space<vmem>>, vector<1x8x4xbf16>
    %39 = vector.shape_cast %38 : vector<1x8x4xbf16> to vector<8x4xbf16>
    %40 = arith.truncf %37 : vector<4x288xf32> to vector<4x288xbf16>
    %cst_22 = arith.constant dense<0.000000e+00> : vector<8x288xf32>
    %41 = tpu.matmul %39, %40, %cst_22 {dimension_numbers = #tpu.dot_dimension_numbers<[1], [0], [0], [1], [0, 0, 1, 1], [], []>} : vector<8x4xbf16>, vector<4x288xbf16>, vector<8x288xf32> -> vector<8x288xf32>
    %42 = arith.addf %36, %41 : vector<8x288xf32>
    %43 = vector.extract_strided_slice %1 {offsets = [0, 37], sizes = [4, 288], strides = [1, 1]} : vector<4x326xf32> to vector<4x288xf32>
    %c7 = arith.constant 7 : index
    %c0_23 = arith.constant 0 : index
    %c0_24 = arith.constant 0 : index
    %44 = vector.load %arg2[%c7, %c0_23, %c0_24] : memref<9x8x4xbf16, #tpu.memory_space<vmem>>, vector<1x8x4xbf16>
    %45 = vector.shape_cast %44 : vector<1x8x4xbf16> to vector<8x4xbf16>
    %46 = arith.truncf %43 : vector<4x288xf32> to vector<4x288xbf16>
    %cst_25 = arith.constant dense<0.000000e+00> : vector<8x288xf32>
    %47 = tpu.matmul %45, %46, %cst_25 {dimension_numbers = #tpu.dot_dimension_numbers<[1], [0], [0], [1], [0, 0, 1, 1], [], []>} : vector<8x4xbf16>, vector<4x288xbf16>, vector<8x288xf32> -> vector<8x288xf32>
    %48 = arith.addf %42, %47 : vector<8x288xf32>
    %49 = vector.extract_strided_slice %1 {offsets = [0, 38], sizes = [4, 288], strides = [1, 1]} : vector<4x326xf32> to vector<4x288xf32>
    %c8 = arith.constant 8 : index
    %c0_26 = arith.constant 0 : index
    %c0_27 = arith.constant 0 : index
    %50 = vector.load %arg2[%c8, %c0_26, %c0_27] : memref<9x8x4xbf16, #tpu.memory_space<vmem>>, vector<1x8x4xbf16>
    %51 = vector.shape_cast %50 : vector<1x8x4xbf16> to vector<8x4xbf16>
    %52 = arith.truncf %49 : vector<4x288xf32> to vector<4x288xbf16>
    %cst_28 = arith.constant dense<0.000000e+00> : vector<8x288xf32>
    %53 = tpu.matmul %51, %52, %cst_28 {dimension_numbers = #tpu.dot_dimension_numbers<[1], [0], [0], [1], [0, 0, 1, 1], [], []>} : vector<8x4xbf16>, vector<4x288xbf16>, vector<8x288xf32> -> vector<8x288xf32>
    %54 = arith.addf %48, %53 : vector<8x288xf32>
    %c0_29 = arith.constant 0 : index
    %c0_30 = arith.constant 0 : index
    %55 = vector.load %arg3[%c0_29, %c0_30] : memref<8x1xf32, #tpu.memory_space<vmem>>, vector<8x1xf32>
    %56 = vector.broadcast %55 : vector<8x1xf32> to vector<8x288xf32>
    %57 = arith.addf %54, %56 : vector<8x288xf32>
    %c0_31 = arith.constant 0 : index
    %c0_32 = arith.constant 0 : index
    %c0_33 = arith.constant 0 : index
    %58 = vector.load %arg4[%c0_31, %c0_32, %c0_33] : memref<1x8x288xf32, #tpu.memory_space<vmem>>, vector<1x8x288xf32>
    %59 = vector.shape_cast %58 : vector<1x8x288xf32> to vector<8x288xf32>
    %60 = vector.shape_cast %57 : vector<8x288xf32> to vector<1x8x288xf32>
    tpu.vector_store %arg4[%c0_31, %c0_32, %c0_33], %60 {strides = array<i32>} : memref<1x8x288xf32, #tpu.memory_space<vmem>>, vector<1x8x288xf32>,
    return
  }
  func.func @transform_0(%arg0: i32) -> (i32, i32, i32) {
    %c0_i32 = arith.constant 0 : i32
    %c0_i32_0 = arith.constant 0 : i32
    %c0_i32_1 = arith.constant 0 : i32
    return %arg0, %c0_i32, %c0_i32_0 : i32, i32, i32
  }
  func.func @transform_1(%arg0: i32) -> (i32, i32, i32) {
    %c0_i32 = arith.constant 0 : i32
    %c0_i32_0 = arith.constant 0 : i32
    %c0_i32_1 = arith.constant 0 : i32
    %c0_i32_2 = arith.constant 0 : i32
    return %c0_i32, %c0_i32_0, %c0_i32_1 : i32, i32, i32
  }
  func.func @transform_2(%arg0: i32) -> (i32, i32) {
    %c0_i32 = arith.constant 0 : i32
    %c0_i32_0 = arith.constant 0 : i32
    %c0_i32_1 = arith.constant 0 : i32
    return %c0_i32, %c0_i32_0 : i32, i32
  }
  func.func @transform_3(%arg0: i32) -> (i32, i32, i32) {
    %c0_i32 = arith.constant 0 : i32
    %c0_i32_0 = arith.constant 0 : i32
    %c0_i32_1 = arith.constant 0 : i32
    return %arg0, %c0_i32, %c0_i32_0 : i32, i32, i32
  }
}

</mosaic_0001>

<bundles_post_ra>
// kernel: parallel_conv2d.1
= control target key start
LH: loop header
LB: loop body
LE: loop exit
PB: predicated region body
PF: predicated region fallthrough
CT: control target
= control target key end

     0   :  { %s1378_s12 = smov 0   ;;  %s1513_s0 = inlined_call_operand.vmem [shape: f32[2,4,326], index: 0, kind: input, shape index: {}]   ;;  %s1514_s1 = inlined_call_operand.vmem [shape: bf16[9,8,4], index: 1, kind: input, shape index: {}]   ;;  %s1515_s2 = inlined_call_operand.vmem [shape: f32[8,1], index: 2, kind: input, shape index: {}]   ;;  %s1516_s3 = inlined_call_operand.vmem [shape: f32[2,8,288], index: 3, kind: output, shape index: {}]  }
   0x1 LB: > { %s1200_s13 = sadd.s32 4294967295, %s1345_s12   ;;  %p1204_p0 = scmp.ge.s32.totalorder %s1345_s12, 1  ;;  %s1345_s12 = sphi %s1378_s12, %s13_s12  }
   0x2   : > { %p137_p1 = scmp.lt.s32.totalorder %s1345_s12, 3 }
   0x4   : > { %p138_p2 = pnand %p1204_p0, %p137_p1 }
   0x5   : > { %p161_p3 = scmp.lt.s32.totalorder (!%p138_p2), %s1200_s13, 1  ;;  %v1347_v0 = vmov (!%p138_p2), 0.0   ;;  %vm1348_vm0 = vmmov (!%p138_p2), 0   ;;  %v1349_v1 = vmov (!%p138_p2), 0   ;;  %s1350_s18 = smov (!%p138_p2), 127   ;;  %v1132_v8 = vld [vmem:[%s1515_s2] sm:$0xff] (!%p138_p2) }
   0x6   : > { %141 = sbr.rel (%p138_p2) target bundleno = 426 (0x1aa), region = 32  ;;  %1262 = vmatprep.subr.bf16.mxu1 (!%p138_p2), %v1347_v0  ;;  %1264 = vmatprep.mubr.msk.bf16.mxu1 (!%p138_p2), %vm1348_vm0, %v1347_v0  ;;  %s1351_s19 = smov (!%p138_p2), 126   ;;  %vm199_vm1 = vcmask (!%p138_p2), 1041408   ;;  %v1207_v12 = vld [vmem:[%s1514_s1 + $0x4] sm:$0xf] (!%p138_p2)  ;;  %vm195_vm2 = vcmask (!%p138_p2), 31744  }
   0x7   : > { %241 = vmatprep.mubr.bf16.mxu0 (!%p138_p2), %v1349_v1  ;;  %1337 = vset.pattern.permute.xlu0 (!%p138_p2), %v1349_v1  ;;  %s1352_s20 = smov (!%p138_p2), 110   ;;  %s1353_s21 = smov (!%p138_p2), 109   ;;  %vm192_vm3 = vcmask (!%p138_p2), 1039360   ;;  %vm391_vm4 = vcmask (!%p138_p2), 1031168   ;;  %v174_v23 = vld [vmem:[%s1514_s1] sm:$0xf] (!%p138_p2) }
   0x8   : > { %s1354_s22 = smov (!%p138_p2), 108   ;;  %s1355_s23 = smov (!%p138_p2), 92   ;;  %vm498_vm5 = vcmask (!%p138_p2), 900096   ;;  %v1214_v32 = vld [vmem:[%s1514_s1 + $0x8] sm:$0xf] (!%p138_p2)  ;;  %vm605_vm6 = vcmask (!%p138_p2), 891904  }
   0x9   : > { %s1356_s24 = smov (!%p138_p2), 91   ;;  %s1357_s25 = smov (!%p138_p2), 90   ;;  %v1218_v40 = vld [vmem:[%s1514_s1 + $0xc] sm:$0xf] (!%p138_p2)  ;;  %vm712_vm7 = vcmask (!%p138_p2), 883712   ;;  %vm819_vm8 = vcmask (!%p138_p2), 752640  }
   0xa   : > { %v1222_v48 = vld [vmem:[%s1514_s1 + $0x10] sm:$0xf] (!%p138_p2)  ;;  %v1226_v56 = vld [vmem:[%s1514_s1 + $0x14] sm:$0xf] (!%p138_p2)  ;;  %vm926_vm9 = vcmask (!%p138_p2), 744448   ;;  %vm1033_vm10 = vcmask (!%p138_p2), 736256  }
   0xb   : > { %vm1143_vm11 = vcmask (!%p138_p2), 261120  }
   0xd   : > { %s1518_s13 = smov (!%p161_p3, %s1200_s13), 1 }
   0xe   : > { %s1316_s14 = smul.u32 12, %s1518_s13 }
  0x10   : > { %s165_s17 = scalar_lea.vmem %s1513_s0, %s1316_s14 }
  0x11   : > { %v173_v2 = vld [vmem:[%s165_s17 + $0x8] sm:$0xf]  ;;  %v172_v3 = vld [vmem:[%s165_s17] sm:$0xff] }
  0x12   : > { %v180_v4 = vpack.c.bf16 %v173_v2, %v173_v2  ;;  %v178_v5 = vpack.c.bf16 %v172_v3, %v172_v3  ;;  %v176_v6 = vcombine.high %v172_v3, %v172_v3  ;;  %v1230_v2 = vld [vmem:[%s1514_s1 + $0x18] sm:$0xf] }
  0x14   : > { %190 = vrot.lane.b32.xlu1 %v180_v4, %s1350_s18  ;;  %186 = vrot.lane.b32.xlu0 %v178_v5, %s1350_s18  ;;  %v179_v7 = vpack.c.bf16 %v176_v6, %v176_v6  ;;  %v300_v13 = vsel %vm199_vm1, %v180_v4, 0  ;;  %v294_v19 = vsel %vm199_vm1, %v178_v5, 0 }
  0x18   : > { %188 = vrot.lane.b32.xlu0 %v179_v7, %s1350_s18  ;;  %385 = vrot.lane.b32.xlu1 %v178_v5, %s1351_s19 }
  0x1c   : > { %387 = vrot.lane.b32.xlu0 %v179_v7, %s1351_s19  ;;  %389 = vrot.lane.b32.xlu1 %v180_v4, %s1351_s19 }
  0x20   : > { %492 = vrot.lane.b32.xlu0 %v178_v5, %s1352_s20  ;;  %494 = vrot.lane.b32.xlu1 %v179_v7, %s1352_s20 }
  0x24   : > { %496 = vrot.lane.b32.xlu0 %v180_v4, %s1352_s20  ;;  %599 = vrot.lane.b32.xlu1 %v178_v5, %s1353_s21 }
  0x28   : > { %601 = vrot.lane.b32.xlu0 %v179_v7, %s1353_s21  ;;  %603 = vrot.lane.b32.xlu1 %v180_v4, %s1353_s21  ;;  %s1317_s21 = smul.u32 24, %s1518_s13 }
  0x2c   : > { %706 = vrot.lane.b32.xlu0 %v178_v5, %s1354_s22  ;;  %708 = vrot.lane.b32.xlu1 %v179_v7, %s1354_s22 }
  0x30   : > { %710 = vrot.lane.b32.xlu0 %v180_v4, %s1354_s22  ;;  %813 = vrot.lane.b32.xlu1 %v178_v5, %s1355_s23 }
  0x34   : > { %815 = vrot.lane.b32.xlu0 %v179_v7, %s1355_s23  ;;  %817 = vrot.lane.b32.xlu1 %v180_v4, %s1355_s23 }
  0x38   : > { %920 = vrot.lane.b32.xlu0 %v178_v5, %s1356_s24  ;;  %922 = vrot.lane.b32.xlu1 %v179_v7, %s1356_s24 }
  0x3c   : > { %924 = vrot.lane.b32.xlu0 %v180_v4, %s1356_s24  ;;  %1027 = vrot.lane.b32.xlu1 %v178_v5, %s1357_s25  ;;  %s170_s24 = scalar_lea.vmem %s1516_s3, %s1317_s21 }
  0x40   : > { %1029 = vrot.lane.b32.xlu0 %v179_v7, %s1357_s25  ;;  %1031 = vrot.lane.b32.xlu1 %v180_v4, %s1357_s25 }
  0x44   : > { %1135 = vperm.xlu0 %1337, %v1132_v8  }
  0x86   : > { %v191_v9 = vpop.permute.xlu1 %190  ;;  %v187_v10 = vpop.permute.xlu0 %186 }
  0x87   : > { %v207_v11 = vsel %vm199_vm1, %v191_v9, 0 }
  0x88   : > { %1263 = vmatpush3.bf16.msra.mxu1 %v207_v11 }
  0x89   : > { %1268 = vmatprep.subr.bf16.mxu1 %v1347_v0 }
  0x8a   : > { %v189_v14 = vpop.permute.xlu0 %188  ;;  %v386_v15 = vpop.permute.xlu1 %385 }
  0x8b   : > { %1265 = vmatmul.mubr.msk.bf16.vlgmr.msra.gmra.mrb[0].mxu1 %vm195_vm2, %v1207_v12  ;;  %v194_v16 = vsel %vm192_vm3, %v189_v14, %v191_v9  ;;  %v193_v17 = vsel %vm192_vm3, %v187_v10, %v189_v14  ;;  %v1234_v9 = vld [vmem:[%s1514_s1 + $0x1c] sm:$0xf] }
  0x8c   : > { %1208 = vmatprep.subr.msk.bf16.mxu0 %vm199_vm1, %v194_v16  ;;  %v201_v18 = vsel %vm199_vm1, %v193_v17, 0  ;;  %1269 = vmatpush3.bf16.msra.mxu1 %v300_v13  ;;  %v1238_v13 = vld [vmem:[%s1514_s1 + $0x20] sm:$0xf] }
  0x8d   : > { %210 = vmatpush1.bf16.msra.mxu0 %v201_v18  ;;  %1270 = vmatprep.mubr.msk.bf16.mxu1 %vm1348_vm0, %v1347_v0 }
  0x8e   : > { %1211 = vmatprep.subr.msk.bf16.mxu0 %vm199_vm1, %v179_v7  ;;  %v388_v20 = vpop.permute.xlu0 %387  ;;  %v390_v21 = vpop.permute.xlu1 %389  ;;  %1274 = vmatprep.subr.bf16.mxu1 %v1347_v0 }
  0x8f   : > { %v393_v22 = vsel %vm391_vm4, %v388_v20, %v390_v21  ;;  %v404_v24 = vsel %vm199_vm1, %v390_v21, 0  ;;  %v392_v27 = vsel %vm391_vm4, %v386_v15, %v388_v20 }
  0x90   : > { %1209 = vmatmul.mubr.msk.bf16.vlgmr.msra.gmra.mrb[0].mxu0 %vm195_vm2, %v1207_v12  ;;  %v398_v28 = vsel %vm199_vm1, %v392_v27, 0 }
  0x91   : > { %303 = vmatpush1.bf16.msra.mxu0 %v294_v19  ;;  %334 = vmatprep.mubr.bf16.mxu0 %v1349_v1 }
  0x92   : > { %1215 = vmatprep.subr.msk.bf16.mxu0 %vm199_vm1, %v393_v22  ;;  %v493_v25 = vpop.permute.xlu0 %492  ;;  %v495_v26 = vpop.permute.xlu1 %494 }
  0x93   : > { %1271 = vmatmul.mubr.msk.bf16.vlgmr.msra.gmra.mrb[4].mxu1 %vm195_vm2, %v174_v23  ;;  %v499_v35 = vsel %vm498_vm5, %v493_v25, %v495_v26 }
  0x94   : > { %1275 = vmatpush3.bf16.msra.mxu1 %v404_v24  ;;  %1276 = vmatprep.mubr.msk.bf16.mxu1 %vm1348_vm0, %v1347_v0  ;;  %v505_v37 = vsel %vm199_vm1, %v499_v35, 0 }
  0x95   : > { %1280 = vmatprep.subr.bf16.mxu1 %v1347_v0 }
  0x96   : > { %v497_v29 = vpop.permute.xlu0 %496  ;;  %v600_v30 = vpop.permute.xlu1 %599 }
  0x97   : > { %v500_v31 = vsel %vm498_vm5, %v495_v26, %v497_v29  ;;  %v511_v33 = vsel %vm199_vm1, %v497_v29, 0 }
  0x98   : > { %1212 = vmatmul.mubr.msk.bf16.vlgmr.msra.gmra.mrb[4].mxu0 %vm195_vm2, %v174_v23 }
  0x99   : > { %407 = vmatpush1.bf16.msra.mxu0 %v398_v28  ;;  %438 = vmatprep.mubr.bf16.mxu0 %v1349_v1 }
  0x9a   : > { %1219 = vmatprep.subr.msk.bf16.mxu0 %vm199_vm1, %v500_v31  ;;  %v602_v34 = vpop.permute.xlu0 %601  ;;  %v604_v36 = vpop.permute.xlu1 %603 }
  0x9b   : > { %1277 = vmatmul.mubr.msk.bf16.vlgmr.msra.gmra.mrb[8].mxu1 %vm195_vm2, %v1214_v32  ;;  %v607_v39 = vsel %vm605_vm6, %v602_v34, %v604_v36  ;;  %v618_v42 = vsel %vm199_vm1, %v604_v36, 0  ;;  %v606_v43 = vsel %vm605_vm6, %v600_v30, %v602_v34 }
  0x9c   : > { %1281 = vmatpush3.bf16.msra.mxu1 %v511_v33  ;;  %1282 = vmatprep.mubr.msk.bf16.mxu1 %vm1348_vm0, %v1347_v0  ;;  %v612_v45 = vsel %vm199_vm1, %v606_v43, 0 }
  0x9d   : > { %1286 = vmatprep.subr.bf16.mxu1 %v1347_v0 }
  0x9e   : > { %v707_v38 = vpop.permute.xlu0 %706  ;;  %v709_v41 = vpop.permute.xlu1 %708 }
  0x9f   : > { %v713_v51 = vsel %vm712_vm7, %v707_v38, %v709_v41 }
  0xa0   : > { %1216 = vmatmul.mubr.msk.bf16.vlgmr.msra.gmra.mrb[8].mxu0 %vm195_vm2, %v1214_v32  ;;  %v719_v53 = vsel %vm199_vm1, %v713_v51, 0 }
  0xa1   : > { %514 = vmatpush1.bf16.msra.mxu0 %v505_v37  ;;  %545 = vmatprep.mubr.bf16.mxu0 %v1349_v1 }
  0xa2   : > { %1223 = vmatprep.subr.msk.bf16.mxu0 %vm199_vm1, %v607_v39  ;;  %v711_v44 = vpop.permute.xlu0 %710  ;;  %v814_v46 = vpop.permute.xlu1 %813 }
  0xa3   : > { %1283 = vmatmul.mubr.msk.bf16.vlgmr.msra.gmra.mrb[12].mxu1 %vm195_vm2, %v1218_v40  ;;  %v714_v47 = vsel %vm712_vm7, %v709_v41, %v711_v44  ;;  %v725_v50 = vsel %vm199_vm1, %v711_v44, 0 }
  0xa4   : > { %1287 = vmatpush3.bf16.msra.mxu1 %v618_v42  ;;  %1288 = vmatprep.mubr.msk.bf16.mxu1 %vm1348_vm0, %v1347_v0 }
  0xa5   : > { %1292 = vmatprep.subr.bf16.mxu1 %v1347_v0 }
  0xa6   : > { %v816_v49 = vpop.permute.xlu0 %815  ;;  %v818_v52 = vpop.permute.xlu1 %817 }
  0xa7   : > { %v821_v55 = vsel %vm819_vm8, %v816_v49, %v818_v52  ;;  %v832_v58 = vsel %vm199_vm1, %v818_v52, 0  ;;  %v820_v59 = vsel %vm819_vm8, %v814_v46, %v816_v49 }
  0xa8   : > { %1220 = vmatmul.mubr.msk.bf16.vlgmr.msra.gmra.mrb[12].mxu0 %vm195_vm2, %v1218_v40  ;;  %v826_v61 = vsel %vm199_vm1, %v820_v59, 0 }
  0xa9   : > { %621 = vmatpush1.bf16.msra.mxu0 %v612_v45  ;;  %652 = vmatprep.mubr.bf16.mxu0 %v1349_v1 }
  0xaa   : > { %1227 = vmatprep.subr.msk.bf16.mxu0 %vm199_vm1, %v714_v47  ;;  %v921_v54 = vpop.permute.xlu0 %920  ;;  %v923_v57 = vpop.permute.xlu1 %922 }
  0xab   : > { %1289 = vmatmul.mubr.msk.bf16.vlgmr.msra.gmra.mrb[16].mxu1 %vm195_vm2, %v1222_v48  ;;  %v927_v4 = vsel %vm926_vm9, %v921_v54, %v923_v57 }
  0xac   : > { %1293 = vmatpush3.bf16.msra.mxu1 %v725_v50  ;;  %1294 = vmatprep.mubr.msk.bf16.mxu1 %vm1348_vm0, %v1347_v0  ;;  %v933_v7 = vsel %vm199_vm1, %v927_v4, 0 }
  0xad   : > { %1298 = vmatprep.subr.bf16.mxu1 %v1347_v0 }
  0xae   : > { %v925_v60 = vpop.permute.xlu0 %924  ;;  %v1028_v62 = vpop.permute.xlu1 %1027 }
  0xaf   : > { %v928_v63 = vsel %vm926_vm9, %v923_v57, %v925_v60  ;;  %v939_v3 = vsel %vm199_vm1, %v925_v60, 0 }
  0xb0   : > { %1224 = vmatmul.mubr.msk.bf16.vlgmr.msra.gmra.mrb[16].mxu0 %vm195_vm2, %v1222_v48 }
  0xb1   : > { %728 = vmatpush1.bf16.msra.mxu0 %v719_v53  ;;  %759 = vmatprep.mubr.bf16.mxu0 %v1349_v1 }
  0xb2   : > { %1231 = vmatprep.subr.msk.bf16.mxu0 %vm199_vm1, %v821_v55  ;;  %v1030_v5 = vpop.permute.xlu0 %1029  ;;  %v1032_v6 = vpop.permute.xlu1 %1031 }
  0xb3   : > { %1295 = vmatmul.mubr.msk.bf16.vlgmr.msra.gmra.mrb[20].mxu1 %vm195_vm2, %v1226_v56  ;;  %v1035_v8 = vsel %vm1033_vm10, %v1030_v5, %v1032_v6  ;;  %v1046_v10 = vsel %vm199_vm1, %v1032_v6, 0  ;;  %v1034_v11 = vsel %vm1033_vm10, %v1028_v62, %v1030_v5 }
  0xb4   : > { %1299 = vmatpush3.bf16.msra.mxu1 %v832_v58  ;;  %1300 = vmatprep.mubr.msk.bf16.mxu1 %vm1348_vm0, %v1347_v0  ;;  %v1040_v12 = vsel %vm199_vm1, %v1034_v11, 0 }
  0xb5   : > { %1304 = vmatprep.subr.bf16.mxu1 %v1347_v0 }
  0xb8   : > { %1228 = vmatmul.mubr.msk.bf16.vlgmr.msra.gmra.mrb[20].mxu0 %vm195_vm2, %v1226_v56 }
  0xb9   : > { %835 = vmatpush1.bf16.msra.mxu0 %v826_v61  ;;  %866 = vmatprep.mubr.bf16.mxu0 %v1349_v1 }
  0xba   : > { %1235 = vmatprep.subr.msk.bf16.mxu0 %vm199_vm1, %v928_v63 }
  0xbb   : > { %1301 = vmatmul.mubr.msk.bf16.vlgmr.msra.gmra.mrb[24].mxu1 %vm195_vm2, %v1230_v2 }
  0xbc   : > { %1305 = vmatpush3.bf16.msra.mxu1 %v939_v3  ;;  %1306 = vmatprep.mubr.msk.bf16.mxu1 %vm1348_vm0, %v1347_v0 }
  0xbd   : > { %1310 = vmatprep.subr.bf16.mxu1 %v1347_v0 }
  0xc0   : > { %1232 = vmatmul.mubr.msk.bf16.vlgmr.msra.gmra.mrb[24].mxu0 %vm195_vm2, %v1230_v2 }
  0xc1   : > { %942 = vmatpush1.bf16.msra.mxu0 %v933_v7  ;;  %973 = vmatprep.mubr.bf16.mxu0 %v1349_v1 }
  0xc2   : > { %1239 = vmatprep.subr.msk.bf16.mxu0 %vm199_vm1, %v1035_v8 }
  0xc3   : > { %1307 = vmatmul.mubr.msk.bf16.vlgmr.msra.gmra.mrb[28].mxu1 %vm195_vm2, %v1234_v9 }
  0xc4   : > { %1311 = vmatpush3.bf16.msra.mxu1 %v1046_v10  ;;  %1312 = vmatprep.mubr.msk.bf16.mxu1 %vm1348_vm0, %v1347_v0 }
  0xc8   : > { %1236 = vmatmul.mubr.msk.bf16.vlgmr.msra.gmra.mrb[28].mxu0 %vm195_vm2, %v1234_v9 }
  0xc9   : > { %1049 = vmatpush1.bf16.msra.mxu0 %v1040_v12  ;;  %1080 = vmatprep.mubr.bf16.mxu0 %v1349_v1 }
  0xcb   : > { %1313 = vmatmul.mubr.msk.bf16.vlgmr.msra.gmra.mrb[32].mxu1 %vm195_vm2, %v1238_v13 }
  0xd0   : > { %1240 = vmatmul.mubr.msk.bf16.vlgmr.msra.gmra.mrb[32].mxu0 %vm195_vm2, %v1238_v13 }
 0x15e   : > { %v284_v14 = vpop.f32.mrb[0].mxu1 }
 0x15f   : > { %v1266_v15 = vpop.f32.mrb[1].mxu1 }
 0x160   : > { %v287_v16 = vpop.f32.mrb[2].mxu1 }
 0x161   : > { %v1267_v17 = vpop.f32.mrb[3].mxu1 }
 0x163   : > { %v243_v0 = vpop.f32.mrb[0].mxu0 }
 0x164   : > { %v245_v18 = vpop.f32.mrb[1].mxu0 }
 0x165   : > { %v247_v19 = vpop.f32.mrb[2].mxu0 }
 0x166   : > { %v248_v20 = vpop.f32.mrb[3].mxu0  ;;  %v377_v21 = vpop.f32.mrb[4].mxu1 }
 0x167   : > { %v378_v22 = vadd.f32 %v377_v21, %v284_v14  ;;  %v1272_v23 = vpop.f32.mrb[5].mxu1 }
 0x168   : > { %v380_v24 = vpop.f32.mrb[6].mxu1 }
 0x169   : > { %v1273_v25 = vpop.f32.mrb[7].mxu1 }
 0x16b   : > { %v336_v26 = vpop.f32.mrb[4].mxu0 }
 0x16c   : > { %v337_v27 = vadd.f32 %v336_v26, %v243_v0  ;;  %v338_v1 = vpop.f32.mrb[5].mxu0 }
 0x16d   : > { %v339_v28 = vadd.f32 %v338_v1, %v245_v18  ;;  %v340_v29 = vpop.f32.mrb[6].mxu0 }
 0x16e   : > { %v341_v30 = vpop.f32.mrb[7].mxu0  ;;  %v481_v31 = vpop.f32.mrb[8].mxu1 }
 0x16f   : > { %v489_v32 = vadd.f32 %v481_v31, %v378_v22  ;;  %v1278_v33 = vpop.f32.mrb[9].mxu1 }
 0x170   : > { %v484_v34 = vpop.f32.mrb[10].mxu1 }
 0x171   : > { %v1279_v35 = vpop.f32.mrb[11].mxu1 }
 0x173   : > { %v440_v36 = vpop.f32.mrb[8].mxu0 }
 0x174   : > { %v487_v37 = vadd.f32 %v440_v36, %v337_v27  ;;  %v442_v38 = vpop.f32.mrb[9].mxu0 }
 0x175   : > { %v488_v39 = vadd.f32 %v442_v38, %v339_v28  ;;  %v444_v40 = vpop.f32.mrb[10].mxu0 }
 0x176   : > { %v445_v41 = vpop.f32.mrb[11].mxu0  ;;  %v588_v42 = vpop.f32.mrb[12].mxu1 }
 0x177   : > { %v596_v43 = vadd.f32 %v588_v42, %v489_v32  ;;  %v1284_v44 = vpop.f32.mrb[13].mxu1  ;;  %v1136_v32 = vpop.permute.xlu0 %1135 }
 0x178   : > { %v591_v45 = vpop.f32.mrb[14].mxu1 }
 0x179   : > { %v1285_v46 = vpop.f32.mrb[15].mxu1 }
 0x17b   : > { %v547_v47 = vpop.f32.mrb[12].mxu0 }
 0x17c   : > { %v594_v48 = vadd.f32 %v547_v47, %v487_v37  ;;  %v549_v49 = vpop.f32.mrb[13].mxu0 }
 0x17d   : > { %v595_v50 = vadd.f32 %v549_v49, %v488_v39  ;;  %v551_v51 = vpop.f32.mrb[14].mxu0 }
 0x17e   : > { %v552_v52 = vpop.f32.mrb[15].mxu0  ;;  %v695_v53 = vpop.f32.mrb[16].mxu1 }
 0x17f   : > { %v703_v54 = vadd.f32 %v695_v53, %v596_v43  ;;  %v1290_v55 = vpop.f32.mrb[17].mxu1 }
 0x180   : > { %v698_v56 = vpop.f32.mrb[18].mxu1 }
 0x181   : > { %v1291_v57 = vpop.f32.mrb[19].mxu1 }
 0x183   : > { %v654_v58 = vpop.f32.mrb[16].mxu0 }
 0x184   : > { %v701_v59 = vadd.f32 %v654_v58, %v594_v48  ;;  %v656_v60 = vpop.f32.mrb[17].mxu0 }
 0x185   : > { %v702_v61 = vadd.f32 %v656_v60, %v595_v50  ;;  %v658_v62 = vpop.f32.mrb[18].mxu0 }
 0x186   : > { %v659_v63 = vpop.f32.mrb[19].mxu0  ;;  %v802_v2 = vpop.f32.mrb[20].mxu1 }
 0x187   : > { %v810_v3 = vadd.f32 %v802_v2, %v703_v54  ;;  %v1296_v4 = vpop.f32.mrb[21].mxu1 }
 0x188   : > { %v805_v5 = vpop.f32.mrb[22].mxu1 }
 0x189   : > { %v1297_v6 = vpop.f32.mrb[23].mxu1 }
 0x18b   : > { %v761_v7 = vpop.f32.mrb[20].mxu0 }
 0x18c   : > { %v808_v8 = vadd.f32 %v761_v7, %v701_v59  ;;  %v763_v9 = vpop.f32.mrb[21].mxu0 }
 0x18d   : > { %v809_v10 = vadd.f32 %v763_v9, %v702_v61  ;;  %v765_v11 = vpop.f32.mrb[22].mxu0 }
 0x18e   : > { %v766_v12 = vpop.f32.mrb[23].mxu0  ;;  %v909_v13 = vpop.f32.mrb[24].mxu1 }
 0x18f   : > { %v917_v14 = vadd.f32 %v909_v13, %v810_v3  ;;  %v1302_v15 = vpop.f32.mrb[25].mxu1 }
 0x190   : > { %v912_v16 = vpop.f32.mrb[26].mxu1 }
 0x191   : > { %v1303_v17 = vpop.f32.mrb[27].mxu1 }
 0x193   : > { %v868_v0 = vpop.f32.mrb[24].mxu0 }
 0x194   : > { %v915_v18 = vadd.f32 %v868_v0, %v808_v8  ;;  %v870_v19 = vpop.f32.mrb[25].mxu0 }
 0x195   : > { %v916_v20 = vadd.f32 %v870_v19, %v809_v10  ;;  %v872_v21 = vpop.f32.mrb[26].mxu0 }
 0x196   : > { %v873_v22 = vpop.f32.mrb[27].mxu0  ;;  %v1016_v23 = vpop.f32.mrb[28].mxu1 }
 0x197   : > { %v1024_v24 = vadd.f32 %v1016_v23, %v917_v14  ;;  %v1308_v25 = vpop.f32.mrb[29].mxu1 }
 0x198   : > { %v1019_v26 = vpop.f32.mrb[30].mxu1 }
 0x199   : > { %v1309_v27 = vpop.f32.mrb[31].mxu1 }
 0x19b   : > { %v975_v1 = vpop.f32.mrb[28].mxu0 }
 0x19c   : > { %v1022_v28 = vadd.f32 %v975_v1, %v915_v18  ;;  %v977_v29 = vpop.f32.mrb[29].mxu0 }
 0x19d   : > { %v1023_v30 = vadd.f32 %v977_v29, %v916_v20  ;;  %v979_v31 = vpop.f32.mrb[30].mxu0 }
 0x19e   : > { %v980_v33 = vpop.f32.mrb[31].mxu0  ;;  %v1123_v34 = vpop.f32.mrb[32].mxu1 }
 0x19f   : > { %v1131_v35 = vadd.f32 %v1123_v34, %v1024_v24  ;;  %v1314_v36 = vpop.f32.mrb[33].mxu1 }
 0x1a0   : > { %v1126_v37 = vpop.f32.mrb[34].mxu1 }
 0x1a1   : > { %v1140_v38 = vadd.f32 %v1136_v32, %v1131_v35  ;;  %v1315_v39 = vpop.f32.mrb[35].mxu1 }
 0x1a3   : > { %1144 = vst.msk [vmem:[%s170_s24 + $0x10] sm:$0xff] %vm1143_vm11, %v1140_v38  ;;  %v1082_v40 = vpop.f32.mrb[32].mxu0 }
 0x1a4   : > { %v1129_v41 = vadd.f32 %v1082_v40, %v1022_v28  ;;  %v1084_v42 = vpop.f32.mrb[33].mxu0 }
 0x1a5   : > { %v1130_v43 = vadd.f32 %v1084_v42, %v1023_v30  ;;  %v1086_v44 = vpop.f32.mrb[34].mxu0 }
 0x1a6   : > { %v1138_v45 = vadd.f32 %v1136_v32, %v1129_v41  ;;  %v1087_v46 = vpop.f32.mrb[35].mxu0 }
 0x1a7   : > { %v1139_v47 = vadd.f32 %v1136_v32, %v1130_v43 }
 0x1a8   : > { %1141 = vst [vmem:[%s170_s24] sm:$0xff] %v1138_v45 }
 0x1a9   : > { %1142 = vst [vmem:[%s170_s24 + $0x8] sm:$0xff] %v1139_v47 }
 0x1aa PF: > { %s13_s12 = sadd.s32 1, %s1345_s12  }
 0x1ab   : > { %p10_p4 = scmp.ge.s32.totalorder %s13_s12, 4  }
 0x1ad   :  { %12 = sbr.rel (!%p10_p4) target bundleno = 1 (0x1), region = 70 }

</bundles_post_ra>
